<compile_context>
chip_gen: v5e
topology: v5e:2x2
jax: 0.10.0
libtpu: 0.0.40
codegen_flags: <defaults>
</compile_context>

<pallas_src>
import math
import functools

import jax
import jax.numpy as jnp
from jax import lax
from jax.experimental import pallas as pl
from jax.experimental.pallas import tpu as pltpu


def _round_up(x, m):
    return ((x + m - 1) // m) * m


def _gelu_exact(x):
    # PyTorch nn.GELU() default is the exact (erf-based) GELU.
    return 0.5 * x * (1.0 + lax.erf(x * (1.0 / math.sqrt(2.0))))


def fake_encoder_kernel(z_ref, w1_ref, b1_ref, w2_ref, b2_ref, w3_ref, b3_ref, o_ref):
    # z_ref: (TM, LP) activation tile; weights (LP, LP) and biases (1, LP) are
    # resident in VMEM across all grid steps (constant index_map).
    h = jnp.dot(z_ref[...], w1_ref[...], preferred_element_type=jnp.float32) + b1_ref[...]
    h = _gelu_exact(h)
    h = jnp.dot(h, w2_ref[...], preferred_element_type=jnp.float32) + b2_ref[...]
    h = _gelu_exact(h)
    h = jnp.dot(h, w3_ref[...], preferred_element_type=jnp.float32) + b3_ref[...]
    o_ref[...] = h.astype(o_ref.dtype)


@functools.partial(jax.jit, static_argnames=())
def fake_encoder_forward(z, params):
    """z: (B, L) float32. params: w1..w3 stored (in_features, out_features), b1..b3 (1, L)."""
    B, L = z.shape

    # Lane-dense padding of the feature dim; sublane-aligned batch tiling.
    LP = _round_up(L, 128)
    TM = min(128, _round_up(B, 8))
    BP = _round_up(B, TM)

    zp = jnp.zeros((BP, LP), z.dtype).at[:B, :L].set(z)

    def pad_w(w):
        return jnp.zeros((LP, LP), w.dtype).at[:L, :L].set(w)

    def pad_b(b):
        return jnp.zeros((1, LP), b.dtype).at[:, :L].set(b)

    w1, w2, w3 = pad_w(params["w1"]), pad_w(params["w2"]), pad_w(params["w3"])
    b1, b2, b3 = pad_b(params["b1"]), pad_b(params["b2"]), pad_b(params["b3"])

    grid = (BP // TM,)

    act_spec = pl.BlockSpec((TM, LP), lambda i: (i, 0))
    # Constant index_map -> weights/biases DMA'd once, resident across grid steps.
    w_spec = pl.BlockSpec((LP, LP), lambda i: (0, 0))
    b_spec = pl.BlockSpec((1, LP), lambda i: (0, 0))

    f32 = 4
    cost = pl.CostEstimate(
        flops=3 * 2 * BP * LP * LP,
        transcendentals=2 * BP * LP,  # two erf-GELU layers
        bytes_accessed=f32 * (2 * BP * LP + 3 * LP * LP + 3 * LP),
    )

    out_padded = pl.pallas_call(
        fake_encoder_kernel,
        out_shape=jax.ShapeDtypeStruct((BP, LP), z.dtype),
        grid=grid,
        in_specs=[act_spec, w_spec, b_spec, w_spec, b_spec, w_spec, b_spec],
        out_specs=act_spec,
        compiler_params=pltpu.CompilerParams(
            dimension_semantics=("parallel",),
        ),
        cost_estimate=cost,
    )(zp, w1, b1, w2, b2, w3, b3)

    return out_padded[:B, :L]


def init_params(key, latent_size):
    """PyTorch Linear default init U(-1/sqrt(in), 1/sqrt(in)).

    Weights stored as (in_features, out_features) — transposed relative to
    PyTorch's (out, in) — so the kernel computes z @ W directly.
    """
    bound = 1.0 / math.sqrt(latent_size)
    keys = jax.random.split(key, 6)

    def u(k, shape):
        return jax.random.uniform(k, shape, jnp.float32, minval=-bound, maxval=bound)

    return {
        "w1": u(keys[0], (latent_size, latent_size)),
        "b1": u(keys[1], (1, latent_size)),
        "w2": u(keys[2], (latent_size, latent_size)),
        "b2": u(keys[3], (1, latent_size)),
        "w3": u(keys[4], (latent_size, latent_size)),
        "b3": u(keys[5], (1, latent_size)),
    }


def reference_forward(z, params):
    h = z @ params["w1"] + params["b1"]
    h = jax.nn.gelu(h, approximate=False)
    h = h @ params["w2"] + params["b2"]
    h = jax.nn.gelu(h, approximate=False)
    h = h @ params["w3"] + params["b3"]
    return h


if __name__ == "__main__":
    latent_size = 32
    batch = 8

    key = jax.random.PRNGKey(0)
    k_z, k_p = jax.random.split(key)

    z = jax.random.normal(k_z, (batch, latent_size), dtype=jnp.float32)
    params = init_params(k_p, latent_size)

    out = fake_encoder_forward(z, params)
    out = jax.block_until_ready(out)

    ref = reference_forward(z, params)
    assert out.shape == (batch, latent_size)
    assert jnp.allclose(out, ref, atol=1e-5, rtol=1e-5), "mismatch vs reference"

    print("KERNEL_OK")
</pallas_src>

<mosaic_0001>
module attributes {stable_mosaic.version = 11 : i64} {
  func.func @fake_encoder_kernel(%arg0: i32, %arg1: memref<8x128xf32, #tpu.memory_space<vmem>>, %arg2: memref<128x128xf32, #tpu.memory_space<vmem>>, %arg3: memref<1x128xf32, #tpu.memory_space<vmem>>, %arg4: memref<128x128xf32, #tpu.memory_space<vmem>>, %arg5: memref<1x128xf32, #tpu.memory_space<vmem>>, %arg6: memref<128x128xf32, #tpu.memory_space<vmem>>, %arg7: memref<1x128xf32, #tpu.memory_space<vmem>>, %arg8: memref<8x128xf32, #tpu.memory_space<vmem>>) attributes {dimension_semantics = [#tpu.dimension_semantics<parallel>], iteration_bounds = array<i64: 1>, scalar_prefetch = 0 : i64, scratch_operands = 0 : i64, tpu.core_type = #tpu.core_type<tc>, window_params = [{transform_indices = @transform_0, window_bounds = array<i64: 8, 128>}, {pipeline_mode = #tpu.pipeline_mode<synchronous>, transform_indices = @transform_1, window_bounds = array<i64: 128, 128>}, {pipeline_mode = #tpu.pipeline_mode<synchronous>, transform_indices = @transform_2, window_bounds = array<i64: 1, 128>}, {pipeline_mode = #tpu.pipeline_mode<synchronous>, transform_indices = @transform_3, window_bounds = array<i64: 128, 128>}, {pipeline_mode = #tpu.pipeline_mode<synchronous>, transform_indices = @transform_4, window_bounds = array<i64: 1, 128>}, {pipeline_mode = #tpu.pipeline_mode<synchronous>, transform_indices = @transform_5, window_bounds = array<i64: 128, 128>}, {pipeline_mode = #tpu.pipeline_mode<synchronous>, transform_indices = @transform_6, window_bounds = array<i64: 1, 128>}, {transform_indices = @transform_7, window_bounds = array<i64: 8, 128>}]} {
    %c0 = arith.constant 0 : index
    %c0_0 = arith.constant 0 : index
    %0 = vector.load %arg1[%c0, %c0_0] : memref<8x128xf32, #tpu.memory_space<vmem>>, vector<8x128xf32>
    %c0_1 = arith.constant 0 : index
    %c0_2 = arith.constant 0 : index
    %1 = vector.load %arg2[%c0_1, %c0_2] : memref<128x128xf32, #tpu.memory_space<vmem>>, vector<128x128xf32>
    %cst = arith.constant dense<0.000000e+00> : vector<8x128xf32>
    %2 = tpu.matmul %0, %1, %cst {dimension_numbers = #tpu.dot_dimension_numbers<[1], [0], [0], [1], [0, 0, 1, 1], [], []>} : vector<8x128xf32>, vector<128x128xf32>, vector<8x128xf32> -> vector<8x128xf32>
    %c0_3 = arith.constant 0 : index
    %c0_4 = arith.constant 0 : index
    %3 = vector.load %arg3[%c0_3, %c0_4] : memref<1x128xf32, #tpu.memory_space<vmem>>, vector<1x128xf32>
    %4 = vector.broadcast %3 : vector<1x128xf32> to vector<8x128xf32>
    %5 = arith.addf %2, %4 : vector<8x128xf32>
    %cst_5 = arith.constant 5.000000e-01 : f32
    %6 = vector.broadcast %cst_5 : f32 to vector<8x128xf32>
    %7 = arith.mulf %6, %5 : vector<8x128xf32>
    %cst_6 = arith.constant 0.707106769 : f32
    %8 = vector.broadcast %cst_6 : f32 to vector<8x128xf32>
    %9 = arith.mulf %5, %8 : vector<8x128xf32>
    %10 = math.erf %9 : vector<8x128xf32>
    %cst_7 = arith.constant 1.000000e+00 : f32
    %11 = vector.broadcast %cst_7 : f32 to vector<8x128xf32>
    %12 = arith.addf %11, %10 : vector<8x128xf32>
    %13 = arith.mulf %7, %12 : vector<8x128xf32>
    %c0_8 = arith.constant 0 : index
    %c0_9 = arith.constant 0 : index
    %14 = vector.load %arg4[%c0_8, %c0_9] : memref<128x128xf32, #tpu.memory_space<vmem>>, vector<128x128xf32>
    %cst_10 = arith.constant dense<0.000000e+00> : vector<8x128xf32>
    %15 = tpu.matmul %13, %14, %cst_10 {dimension_numbers = #tpu.dot_dimension_numbers<[1], [0], [0], [1], [0, 0, 1, 1], [], []>} : vector<8x128xf32>, vector<128x128xf32>, vector<8x128xf32> -> vector<8x128xf32>
    %c0_11 = arith.constant 0 : index
    %c0_12 = arith.constant 0 : index
    %16 = vector.load %arg5[%c0_11, %c0_12] : memref<1x128xf32, #tpu.memory_space<vmem>>, vector<1x128xf32>
    %17 = vector.broadcast %16 : vector<1x128xf32> to vector<8x128xf32>
    %18 = arith.addf %15, %17 : vector<8x128xf32>
    %cst_13 = arith.constant 5.000000e-01 : f32
    %19 = vector.broadcast %cst_13 : f32 to vector<8x128xf32>
    %20 = arith.mulf %19, %18 : vector<8x128xf32>
    %cst_14 = arith.constant 0.707106769 : f32
    %21 = vector.broadcast %cst_14 : f32 to vector<8x128xf32>
    %22 = arith.mulf %18, %21 : vector<8x128xf32>
    %23 = math.erf %22 : vector<8x128xf32>
    %cst_15 = arith.constant 1.000000e+00 : f32
    %24 = vector.broadcast %cst_15 : f32 to vector<8x128xf32>
    %25 = arith.addf %24, %23 : vector<8x128xf32>
    %26 = arith.mulf %20, %25 : vector<8x128xf32>
    %c0_16 = arith.constant 0 : index
    %c0_17 = arith.constant 0 : index
    %27 = vector.load %arg6[%c0_16, %c0_17] : memref<128x128xf32, #tpu.memory_space<vmem>>, vector<128x128xf32>
    %cst_18 = arith.constant dense<0.000000e+00> : vector<8x128xf32>
    %28 = tpu.matmul %26, %27, %cst_18 {dimension_numbers = #tpu.dot_dimension_numbers<[1], [0], [0], [1], [0, 0, 1, 1], [], []>} : vector<8x128xf32>, vector<128x128xf32>, vector<8x128xf32> -> vector<8x128xf32>
    %c0_19 = arith.constant 0 : index
    %c0_20 = arith.constant 0 : index
    %29 = vector.load %arg7[%c0_19, %c0_20] : memref<1x128xf32, #tpu.memory_space<vmem>>, vector<1x128xf32>
    %30 = vector.broadcast %29 : vector<1x128xf32> to vector<8x128xf32>
    %31 = arith.addf %28, %30 : vector<8x128xf32>
    %c0_21 = arith.constant 0 : index
    %c0_22 = arith.constant 0 : index
    %32 = vector.load %arg8[%c0_21, %c0_22] : memref<8x128xf32, #tpu.memory_space<vmem>>, vector<8x128xf32>
    tpu.vector_store %arg8[%c0_21, %c0_22], %31 {strides = array<i32>} : memref<8x128xf32, #tpu.memory_space<vmem>>, vector<8x128xf32>,
    return
  }
  func.func @transform_0(%arg0: i32) -> (i32, i32) {
    %c0_i32 = arith.constant 0 : i32
    %c0_i32_0 = arith.constant 0 : i32
    return %arg0, %c0_i32 : i32, i32
  }
  func.func @transform_1(%arg0: i32) -> (i32, i32) {
    %c0_i32 = arith.constant 0 : i32
    %c0_i32_0 = arith.constant 0 : i32
    %c0_i32_1 = arith.constant 0 : i32
    return %c0_i32, %c0_i32_0 : i32, i32
  }
  func.func @transform_2(%arg0: i32) -> (i32, i32) {
    %c0_i32 = arith.constant 0 : i32
    %c0_i32_0 = arith.constant 0 : i32
    %c0_i32_1 = arith.constant 0 : i32
    return %c0_i32, %c0_i32_0 : i32, i32
  }
  func.func @transform_3(%arg0: i32) -> (i32, i32) {
    %c0_i32 = arith.constant 0 : i32
    %c0_i32_0 = arith.constant 0 : i32
    %c0_i32_1 = arith.constant 0 : i32
    return %c0_i32, %c0_i32_0 : i32, i32
  }
  func.func @transform_4(%arg0: i32) -> (i32, i32) {
    %c0_i32 = arith.constant 0 : i32
    %c0_i32_0 = arith.constant 0 : i32
    %c0_i32_1 = arith.constant 0 : i32
    return %c0_i32, %c0_i32_0 : i32, i32
  }
  func.func @transform_5(%arg0: i32) -> (i32, i32) {
    %c0_i32 = arith.constant 0 : i32
    %c0_i32_0 = arith.constant 0 : i32
    %c0_i32_1 = arith.constant 0 : i32
    return %c0_i32, %c0_i32_0 : i32, i32
  }
  func.func @transform_6(%arg0: i32) -> (i32, i32) {
    %c0_i32 = arith.constant 0 : i32
    %c0_i32_0 = arith.constant 0 : i32
    %c0_i32_1 = arith.constant 0 : i32
    return %c0_i32, %c0_i32_0 : i32, i32
  }
  func.func @transform_7(%arg0: i32) -> (i32, i32) {
    %c0_i32 = arith.constant 0 : i32
    %c0_i32_0 = arith.constant 0 : i32
    return %arg0, %c0_i32 : i32, i32
  }
}

</mosaic_0001>

<bundles_post_ra>
// kernel: fake_encoder_forward.1
= control target key start
LH: loop header
LB: loop body
LE: loop exit
PB: predicated region body
PF: predicated region fallthrough
CT: control target
= control target key end

     0   :  { %s489_s0 = inlined_call_operand.vmem [shape: f32[8,128], index: 0, kind: input, shape index: {}]   ;;  %s490_s1 = inlined_call_operand.vmem [shape: f32[128,128], index: 1, kind: input, shape index: {}]   ;;  %s491_s2 = inlined_call_operand.vmem [shape: f32[1,128], index: 2, kind: input, shape index: {}]   ;;  %s492_s3 = inlined_call_operand.vmem [shape: f32[128,128], index: 3, kind: input, shape index: {}]   ;;  %s493_s4 = inlined_call_operand.vmem [shape: f32[1,128], index: 4, kind: input, shape index: {}]   ;;  %s494_s5 = inlined_call_operand.vmem [shape: f32[128,128], index: 5, kind: input, shape index: {}]   ;;  %s495_s6 = inlined_call_operand.vmem [shape: f32[1,128], index: 6, kind: input, shape index: {}]   ;;  %s496_s7 = inlined_call_operand.hbm [shape: f32[8,128], index: 7, kind: output, shape index: {}]  }
   0x1   :  { %v43_v0 = vld [vmem:[%s490_s1 + $0x78] sm:$0xff]  ;;  %v42_v1 = vld [vmem:[%s490_s1 + $0x70] sm:$0xff]  ;;  %v41_v2 = vld [vmem:[%s490_s1 + $0x68] sm:$0xff] }
   0x2   :  { %48 = vmatpush.msra.mxu0 %v43_v0  ;;  %v40_v3 = vld [vmem:[%s490_s1 + $0x60] sm:$0xff]  ;;  %v39_v4 = vld [vmem:[%s490_s1 + $0x58] sm:$0xff] }
   0x4   :  { %49 = vmatpush.msra.mxu0 %v42_v1 }
   0x6   :  { %50 = vmatpush.msra.mxu0 %v41_v2 }
   0x8   :  { %51 = vmatpush.msra.mxu0 %v40_v3 }
   0x9   :  { %12 = vsyncpa [#allocation3], 0  ;;  %v38_v5 = vld [vmem:[%s490_s1 + $0x50] sm:$0xff]  ;;  %v37_v6 = vld [vmem:[%s490_s1 + $0x48] sm:$0xff]  ;;  %s289_s24 = smov [#allocation2]  }
   0xa   :  { %52 = vmatpush.msra.mxu0 %v39_v4  ;;  %v36_v7 = vld [vmem:[%s490_s1 + $0x40] sm:$0xff]  ;;  %v35_v8 = vld [vmem:[%s490_s1 + $0x38] sm:$0xff]  ;;  %v34_v9 = vld [vmem:[%s490_s1 + $0x30] sm:$0xff]  ;;  %s242_s25 = sshll.u32 %s289_s24, 4  ;;  %s243_s25 = int_to_ptr.vmem [resolvable:$true] %s242_s25 }
   0xb   :  { %v33_v10 = vld [vmem:[%s490_s1 + $0x28] sm:$0xff]  ;;  %v32_v11 = vld [vmem:[%s490_s1 + $0x20] sm:$0xff]  ;;  %v31_v12 = vld [vmem:[%s490_s1 + $0x18] sm:$0xff] }
   0xc   :  { %53 = vmatpush.msra.mxu0 %v38_v5  ;;  %v30_v13 = vld [vmem:[%s490_s1 + $0x10] sm:$0xff]  ;;  %v29_v14 = vld [vmem:[%s490_s1 + $0x8] sm:$0xff]  ;;  %v28_v15 = vld [vmem:[%s490_s1] sm:$0xff] }
   0xd   :  { %v27_v16 = vld [vmem:[%s489_s0] sm:$0xff]  ;;  %v127_v17 = vld [vmem:[%s492_s3 + $0x78] sm:$0xff]  ;;  %v126_v18 = vld [vmem:[%s492_s3 + $0x70] sm:$0xff] }
   0xe   :  { %54 = vmatpush.msra.mxu0 %v37_v6  ;;  %132 = vmatpush.msra.mxu1 %v127_v17  ;;  %v125_v19 = vld [vmem:[%s492_s3 + $0x68] sm:$0xff]  ;;  %v124_v20 = vld [vmem:[%s492_s3 + $0x60] sm:$0xff]  ;;  %v123_v22 = vld [vmem:[%s492_s3 + $0x58] sm:$0xff] }
   0xf   :  { %v256_v21 = vld [vmem:[%s491_s2] ss:$0 sm:$0xff]  ;;  %v122_v23 = vld [vmem:[%s492_s3 + $0x50] sm:$0xff]  ;;  %v121_v25 = vld [vmem:[%s492_s3 + $0x48] sm:$0xff]  ;;  %s244_s2 = sshll.u32 %s496_s7, 4  ;;  %s245_s2 = int_to_ptr.hbm [resolvable:$true] %s244_s2 }
  0x10   :  { %55 = vmatpush.msra.mxu0 %v36_v7  ;;  %133 = vmatpush.msra.mxu1 %v126_v18  ;;  %v120_v27 = vld [vmem:[%s492_s3 + $0x40] sm:$0xff]  ;;  %v119_v29 = vld [vmem:[%s492_s3 + $0x38] sm:$0xff]  ;;  %v118_v31 = vld [vmem:[%s492_s3 + $0x30] sm:$0xff] }
  0x11   :  { %v117_v33 = vld [vmem:[%s492_s3 + $0x28] sm:$0xff]  ;;  %v116_v36 = vld [vmem:[%s492_s3 + $0x20] sm:$0xff]  ;;  %v115_v39 = vld [vmem:[%s492_s3 + $0x18] sm:$0xff] }
  0x12   :  { %56 = vmatpush.msra.mxu0 %v35_v8  ;;  %134 = vmatpush.msra.mxu1 %v125_v19  ;;  %v114_v42 = vld [vmem:[%s492_s3 + $0x10] sm:$0xff]  ;;  %v113_v45 = vld [vmem:[%s492_s3 + $0x8] sm:$0xff]  ;;  %v112_v47 = vld [vmem:[%s492_s3] sm:$0xff] }
  0x13   :  { %v206_v17 = vld [vmem:[%s494_s5 + $0x50] sm:$0xff] }
  0x14   :  { %57 = vmatpush.msra.mxu0 %v34_v9  ;;  %135 = vmatpush.msra.mxu1 %v124_v20  ;;  %v205_v20 = vld [vmem:[%s494_s5 + $0x48] sm:$0xff] }
  0x16   :  { %58 = vmatpush.msra.mxu0 %v33_v10  ;;  %136 = vmatpush.msra.mxu1 %v123_v22  ;;  %v204_v22 = vld [vmem:[%s494_s5 + $0x40] sm:$0xff] }
  0x18   :  { %59 = vmatpush.msra.mxu0 %v32_v11  ;;  %137 = vmatpush.msra.mxu1 %v122_v23  ;;  %v211_v11 = vld [vmem:[%s494_s5 + $0x78] sm:$0xff] }
  0x19   :  { %216 = vmatpush.msra.mxu2 %v211_v11 }
  0x1a   :  { %60 = vmatpush.msra.mxu0 %v31_v12  ;;  %138 = vmatpush.msra.mxu1 %v121_v25  ;;  %v210_v12 = vld [vmem:[%s494_s5 + $0x70] sm:$0xff] }
  0x1b   :  { %217 = vmatpush.msra.mxu2 %v210_v12 }
  0x1c   :  { %61 = vmatpush.msra.mxu0 %v30_v13  ;;  %139 = vmatpush.msra.mxu1 %v120_v27  ;;  %v209_v13 = vld [vmem:[%s494_s5 + $0x68] sm:$0xff] }
  0x1d   :  { %218 = vmatpush.msra.mxu2 %v209_v13 }
  0x1e   :  { %62 = vmatpush.msra.mxu0 %v29_v14  ;;  %140 = vmatpush.msra.mxu1 %v119_v29  ;;  %v257_v14 = vld [vmem:[%s493_s4] ss:$0 sm:$0xff] }
  0x20   :  { %63 = vmatpush.msra.mxu0 %v28_v15  ;;  %141 = vmatpush.msra.mxu1 %v118_v31  ;;  %v208_v15 = vld [vmem:[%s494_s5 + $0x60] sm:$0xff] }
  0x21   :  { %64 = vmatmul.f32.vlgmr.msra.gmra.mxu0 %v27_v16  ;;  %v207_v16 = vld [vmem:[%s494_s5 + $0x58] sm:$0xff]  ;;  %219 = vmatpush.msra.mxu2 %v208_v15  ;;  %v200_v31 = vld [vmem:[%s494_s5 + $0x20] sm:$0xff] }
  0x22   :  { %142 = vmatpush.msra.mxu1 %v117_v33 }
  0x23   :  { %220 = vmatpush.msra.mxu2 %v207_v16 }
  0x24   :  { %143 = vmatpush.msra.mxu1 %v116_v36  ;;  %v198_v36 = vld [vmem:[%s494_s5 + $0x10] sm:$0xff] }
  0x25   :  { %221 = vmatpush.msra.mxu2 %v206_v17 }
  0x26   :  { %144 = vmatpush.msra.mxu1 %v115_v39  ;;  %v197_v39 = vld [vmem:[%s494_s5 + $0x8] sm:$0xff] }
  0x27   :  { %222 = vmatpush.msra.mxu2 %v205_v20 }
  0x28   :  { %145 = vmatpush.msra.mxu1 %v114_v42 }
  0x29   :  { %223 = vmatpush.msra.mxu2 %v204_v22 }
  0x2a   :  { %146 = vmatpush.msra.mxu1 %v113_v45 }
  0x2c   :  { %147 = vmatpush.msra.mxu1 %v112_v47 }
  0x9e   :  { %v65_v24 = vpop.f32.mrf.mxu0 }
  0x9f   :  { %v66_v26 = vadd.f32 %v256_v21, %v65_v24  ;;  %v203_v24 = vld [vmem:[%s494_s5 + $0x38] sm:$0xff] }
  0xa0   :  { %224 = vmatpush.msra.mxu2 %v203_v24 }
  0xa1   :  { %v69_v28 = vmul.f32 0.70710677, %v66_v26  ;;  %v68_v8 = vmul.f32 0.5, %v66_v26  ;;  %v202_v26 = vld [vmem:[%s494_s5 + $0x30] sm:$0xff] }
  0xa2   :  { %225 = vmatpush.msra.mxu2 %v202_v26 }
  0xa3   :  { %v70_v30 = vmul.f32 %v69_v28, %v69_v28 }
  0xa5   :  { %v71_v32 = vmin.f32 %v70_v30, 16.0 }
  0xa7   :  { %v72_v34 = vmul.f32 2.1237322e-06, %v71_v32  ;;  %v83_v35 = vmul.f32 3.8918573e-05, %v71_v32 }
  0xa9   :  { %v73_v37 = vadd.f32 0.00028619796, %v72_v34  ;;  %v84_v38 = vadd.f32 0.001143296, %v83_v35  ;;  %v199_v34 = vld [vmem:[%s494_s5 + $0x18] sm:$0xff] }
  0xab   :  { %v74_v40 = vmul.f32 %v73_v37, %v71_v32  ;;  %v85_v41 = vmul.f32 %v84_v38, %v71_v32 }
  0xad   :  { %v86_v43 = vadd.f32 0.014752088, %v85_v41  ;;  %v75_v44 = vadd.f32 0.0036580483, %v74_v40  ;;  %v196_v41 = vld [vmem:[%s494_s5] sm:$0xff] }
  0xaf   :  { %v87_v46 = vmul.f32 %v86_v43, %v71_v32  ;;  %v76_v49 = vmul.f32 %v75_v44, %v71_v32 }
  0xb1   :  { %v88_v48 = vadd.f32 0.112945676, %v87_v46  ;;  %v77_v52 = vadd.f32 0.05243302, %v76_v49 }
  0xb3   :  { %v89_v50 = vmul.f32 %v88_v48, %v71_v32  ;;  %v78_v55 = vmul.f32 %v77_v52, %v71_v32 }
  0xb5   :  { %v90_v51 = vadd.f32 0.4994258, %v89_v50  ;;  %v79_v56 = vadd.f32 0.18741608, %v78_v55 }
  0xb7   :  { %v91_v53 = vmul.f32 %v90_v51, %v71_v32  ;;  %v80_v58 = vmul.f32 %v79_v56, %v71_v32 }
  0xb9   :  { %v92_v54 = vadd.f32 1.0, %v91_v53  ;;  %v81_v62 = vadd.f32 1.1283791, %v80_v58 }
  0xbb   :  { %259 = vrcp.f32 %v92_v54  ;;  %v104_v61 = vand.u32 2147483648, %v92_v54  ;;  %v102_v0 = vand.u32 2147483647, %v92_v54  ;;  %vm98_vm1 = vweird.f32 %v92_v54 }
  0xbc   :  { %v82_v3 = vmul.f32 %v81_v62, %v69_v28  ;;  %v201_v28 = vld [vmem:[%s494_s5 + $0x28] sm:$0xff] }
  0xbd   :  { %v105_v2 = vor.u32 1.1754944e-38, %v104_v61  ;;  %vm103_vm3 = vcmp.eq.f32.partialorder %v102_v0, 8.507059e+37  ;;  %226 = vmatpush.msra.mxu2 %v201_v28 }
  0xbf   :  { %227 = vmatpush.msra.mxu2 %v200_v31 }
  0xc1   :  { %v260_v57 = vpop.eup %259  ;;  %228 = vmatpush.msra.mxu2 %v199_v34 }
  0xc2   :  { %v94_v59 = vmul.f32 %v260_v57, %v92_v54  ;;  %vm99_vm0 = vweird.f32 %v260_v57 }
  0xc3   :  { %vm100_vm2 = vmor %vm98_vm1, %vm99_vm0  ;;  %229 = vmatpush.msra.mxu2 %v198_v36 }
  0xc4   :  { %v95_v60 = vsub.f32 1.0, %v94_v59 }
  0xc5   :  { %230 = vmatpush.msra.mxu2 %v197_v39 }
  0xc6   :  { %v96_v63 = vmul.f32 %v260_v57, %v95_v60 }
  0xc7   :  { %231 = vmatpush.msra.mxu2 %v196_v41 }
  0xc8   :  { %v97_v1 = vadd.f32 %v260_v57, %v96_v63 }
  0xca   :  { %v101_v4 = vsel %vm100_vm2, %v260_v57, %v97_v1 }
  0xcb   :  { %v106_v5 = vsel %vm103_vm3, %v105_v2, %v101_v4 }
  0xcc   :  { %v107_v6 = vmul.f32 %v106_v5, %v82_v3  ;;  %v258_v5 = vld [vmem:[%s495_s6] ss:$0 sm:$0xff] }
  0xce   :  { %v253_v7 = vclamps-f32 %v107_v6, 1.0 }
  0xd0   :  { %v110_v9 = vadd.f32 1.0, %v253_v7 }
  0xd2   :  { %v111_v10 = vmul.f32 %v110_v9, %v68_v8 }
  0xd4   :  { %148 = vmatmul.f32.vlgmr.msra.gmra.mxu1 %v111_v10 }
 0x151   :  { %v149_v18 = vpop.f32.mrf.mxu1 }
 0x152   :  { %v150_v19 = vadd.f32 %v257_v14, %v149_v18 }
 0x154   :  { %v153_v21 = vmul.f32 0.70710677, %v150_v19  ;;  %v152_v2 = vmul.f32 0.5, %v150_v19 }
 0x156   :  { %v154_v23 = vmul.f32 %v153_v21, %v153_v21 }
 0x158   :  { %v155_v25 = vmin.f32 %v154_v23, 16.0 }
 0x15a   :  { %v156_v27 = vmul.f32 2.1237322e-06, %v155_v25  ;;  %v167_v29 = vmul.f32 3.8918573e-05, %v155_v25 }
 0x15c   :  { %v157_v30 = vadd.f32 0.00028619796, %v156_v27  ;;  %v168_v32 = vadd.f32 0.001143296, %v167_v29 }
 0x15e   :  { %v158_v33 = vmul.f32 %v157_v30, %v155_v25  ;;  %v169_v35 = vmul.f32 %v168_v32, %v155_v25 }
 0x160   :  { %v170_v37 = vadd.f32 0.014752088, %v169_v35  ;;  %v159_v38 = vadd.f32 0.0036580483, %v158_v33 }
 0x162   :  { %v171_v40 = vmul.f32 %v170_v37, %v155_v25  ;;  %v160_v43 = vmul.f32 %v159_v38, %v155_v25 }
 0x164   :  { %v172_v42 = vadd.f32 0.112945676, %v171_v40  ;;  %v161_v46 = vadd.f32 0.05243302, %v160_v43 }
 0x166   :  { %v173_v44 = vmul.f32 %v172_v42, %v155_v25  ;;  %v162_v49 = vmul.f32 %v161_v46, %v155_v25 }
 0x168   :  { %v174_v45 = vadd.f32 0.4994258, %v173_v44  ;;  %v163_v50 = vadd.f32 0.18741608, %v162_v49 }
 0x16a   :  { %v175_v47 = vmul.f32 %v174_v45, %v155_v25  ;;  %v164_v52 = vmul.f32 %v163_v50, %v155_v25 }
 0x16c   :  { %v176_v48 = vadd.f32 1.0, %v175_v47  ;;  %v165_v56 = vadd.f32 1.1283791, %v164_v52 }
 0x16e   :  { %261 = vrcp.f32 %v176_v48  ;;  %v188_v55 = vand.u32 2147483648, %v176_v48  ;;  %v186_v58 = vand.u32 2147483647, %v176_v48  ;;  %vm182_vm5 = vweird.f32 %v176_v48 }
 0x16f   :  { %v166_v61 = vmul.f32 %v165_v56, %v153_v21 }
 0x170   :  { %v189_v60 = vor.u32 1.1754944e-38, %v188_v55  ;;  %vm187_vm7 = vcmp.eq.f32.partialorder %v186_v58, 8.507059e+37 }
 0x174   :  { %v262_v51 = vpop.eup %261 }
 0x175   :  { %v178_v53 = vmul.f32 %v262_v51, %v176_v48  ;;  %vm183_vm4 = vweird.f32 %v262_v51 }
 0x176   :  { %vm184_vm6 = vmor %vm182_vm5, %vm183_vm4 }
 0x177   :  { %v179_v54 = vsub.f32 1.0, %v178_v53 }
 0x179   :  { %v180_v57 = vmul.f32 %v262_v51, %v179_v54 }
 0x17b   :  { %v181_v59 = vadd.f32 %v262_v51, %v180_v57 }
 0x17d   :  { %v185_v62 = vsel %vm184_vm6, %v262_v51, %v181_v59 }
 0x17e   :  { %v190_v63 = vsel %vm187_vm7, %v189_v60, %v185_v62 }
 0x17f   :  { %v191_v0 = vmul.f32 %v190_v63, %v166_v61 }
 0x181   :  { %v254_v1 = vclamps-f32 %v191_v0, 1.0 }
 0x183   :  { %v194_v3 = vadd.f32 1.0, %v254_v1 }
 0x185   :  { %v195_v4 = vmul.f32 %v194_v3, %v152_v2 }
 0x187   :  { %232 = vmatmul.f32.vlgmr.msra.gmra.mxu2 %v195_v4 }
 0x20a   :  { %v233_v6 = vpop.f32.mrf.mxu2 }
 0x20b   :  { %v234_v7 = vadd.f32 %v258_v5, %v233_v6 }
 0x20d   :  { %236 = vst [vmem:[#allocation2] sm:$0xff] %v234_v7 }
 0x20e   :  { %247 = dma.vmem_to_hbm [thread:$0]  %s243_s25, 128, %s245_s2, [#allocation3]  }
 0x20f   :  { %287 = dma.done.wait [#allocation3], 128  }
 0x210   :  { %288 = vsyncadd [#allocation3], 4294967168 }
 0x211   :  { %252 = vsyncpa [#allocation3], 1 }

</bundles_post_ra>
